<compile_context>
chip_gen: v5e
topology: v5e:2x2
jax: 0.10.0
libtpu: 0.0.40
codegen_flags: <defaults>
</compile_context>

<pallas_src>
import numpy as np
import jax
import jax.numpy as jnp
from jax.experimental import pallas as pl
from jax.experimental.pallas import tpu as pltpu


# --------------------------------------------------------------------------
# Weight construction (matches ATen HelperInterpCubic::aa_filter, A = -0.5)
# --------------------------------------------------------------------------
def _bicubic_aa_filter(x, A=-0.5):
    x = abs(x)
    if x < 1.0:
        return ((A + 2.0) * x - (A + 3.0)) * x * x + 1.0
    if x < 2.0:
        return A * (((x - 5.0) * x + 8.0) * x - 4.0)
    return 0.0


def _resize_weight_matrix(in_size, out_size, scale):
    """Dense (out_size, in_size) matrix of antialiased bicubic weights."""
    support = 2.0 * scale if scale >= 1.0 else 2.0
    invscale = 1.0 / scale if scale >= 1.0 else 1.0
    W = np.zeros((out_size, in_size), dtype=np.float64)
    for i in range(out_size):
        center = scale * (i + 0.5)
        xmin = max(int(center - support + 0.5), 0)   # int() truncates like the C++ cast
        xmax = min(int(center + support + 0.5), in_size)
        ws = np.array(
            [_bicubic_aa_filter((j + xmin - center + 0.5) * invscale)
             for j in range(xmax - xmin)],
            dtype=np.float64,
        )
        tot = ws.sum()
        if tot != 0.0:
            ws = ws / tot
        W[i, xmin:xmax] = ws
    return W.astype(np.float32)


# --------------------------------------------------------------------------
# Pallas wrapper: per grid step, NB images are resized with two MXU matmuls
# --------------------------------------------------------------------------
def super_resolution_operator(x, scale_factor, *, compute_dtype=None):
    """JAX/Pallas equivalent of SuperResolutionOperator(scale_factor).forward(x).

    x: (B, C, H, W) -> (B, C, floor(H/scale_factor), floor(W/scale_factor)).
    compute_dtype=None keeps float32 math (matches PyTorch); jnp.bfloat16 trades ~1e-3
    relative accuracy for 2-4x MXU throughput and half the input DMA traffic.
    """
    B, C, H, W = x.shape
    inv = 1.0 / float(scale_factor)          # the scale_factor F.interpolate receives
    out_h = int(np.floor(H * inv))
    out_w = int(np.floor(W * inv))
    scale = 1.0 / inv                        # what ATen recovers via compute_scales_value

    out_dtype = x.dtype
    compute_dtype = jnp.dtype(jnp.float32 if compute_dtype is None else compute_dtype)

    wh = jnp.asarray(_resize_weight_matrix(H, out_h, scale), dtype=compute_dtype)     # (out_h, H)
    wwt = jnp.asarray(_resize_weight_matrix(W, out_w, scale).T, dtype=compute_dtype)  # (W, out_w)

    N = B * C
    xr = x.reshape(N, H, W).astype(compute_dtype)   # single XLA-side cast (no-op for f32 input)

    width_first = H >= W                            # contract the longer spatial axis second

    # ---- choose NB (images per grid step) ------------------------------------------------
    isz = int(compute_dtype.itemsize)
    osz = int(jnp.dtype(out_dtype).itemsize)
    per_img = (2 * H * W * isz                      # double-buffered input block
               + 2 * out_h * out_w * osz            # double-buffered output block
               + H * max(out_w, W) * 4              # f32 stage intermediate
               + H * W * isz                        # possible reshape materialization
               + out_h * W * isz)                   # height-first scratch
    weight_bytes = 2 * (out_h * H + W * out_w) * isz
    budget = 16 * 1024 * 1024 - weight_bytes        # conservative: fits every generation
    nb_mem = max(1, budget // max(per_img, 1))
    rows = H if width_first else max(out_h, 1)
    nb_flops = max(1, int(pl.cdiv(512, rows)))      # target flattened M of ~512 rows
    NB = int(min(nb_mem, nb_flops, N, 64))          # 64 caps the unrolled in-kernel loop
    if N >= 2:
        NB = min(NB, int(pl.cdiv(N, 2)))            # keep >= 2 grid steps (v7x: 2 TensorCores)
    NB = max(int(NB), 1)
    G = int(pl.cdiv(N, NB))

    Npad = G * NB
    if Npad != N:
        xr = jnp.pad(xr, ((0, Npad - N), (0, 0), (0, 0)))

    # ---- kernels ---------------------------------------------------------------------------
    def kernel_width_first(x_ref, wh_ref, wwt_ref, o_ref):
        # stage 1 (width): one flattened matmul over all NB images
        x2 = x_ref[...].reshape(NB * H, W)
        xw = jnp.dot(x2, wwt_ref[...], preferred_element_type=jnp.float32)   # (NB*H, out_w)
        xw = xw.reshape(NB, H, out_w).astype(compute_dtype)
        wh_v = wh_ref[...]
        # stage 2 (height): per image (unrolled; NB <= 64)
        for n in range(NB):
            y = jnp.dot(wh_v, xw[n], preferred_element_type=jnp.float32)     # (out_h, out_w)
            o_ref[n, :, :] = y.astype(o_ref.dtype)

    def kernel_height_first(x_ref, wh_ref, wwt_ref, o_ref, t_ref):
        wh_v = wh_ref[...]
        xv = x_ref[...]
        # stage 1 (height): per image, into VMEM scratch
        for n in range(NB):
            t = jnp.dot(wh_v, xv[n], preferred_element_type=jnp.float32)     # (out_h, W)
            t_ref[n, :, :] = t.astype(compute_dtype)
        # stage 2 (width): one flattened matmul over all NB images
        t2 = t_ref[...].reshape(NB * out_h, W)
        y = jnp.dot(t2, wwt_ref[...], preferred_element_type=jnp.float32)    # (NB*out_h, out_w)
        o_ref[...] = y.reshape(NB, out_h, out_w).astype(o_ref.dtype)

    if width_first:
        kernel = kernel_width_first
        scratch = []
    else:
        kernel = kernel_height_first
        scratch = [pltpu.VMEM((NB, out_h, W), compute_dtype)]

    y = pl.pallas_call(
        kernel,
        out_shape=jax.ShapeDtypeStruct((Npad, out_h, out_w), out_dtype),
        grid=(G,),
        in_specs=[
            pl.BlockSpec((NB, H, W), lambda g: (g, 0, 0)),      # NB images per step
            pl.BlockSpec((out_h, H), lambda g: (0, 0)),         # height-resize weights (resident)
            pl.BlockSpec((W, out_w), lambda g: (0, 0)),         # width-resize weights (transposed)
        ],
        out_specs=pl.BlockSpec((NB, out_h, out_w), lambda g: (g, 0, 0)),
        scratch_shapes=scratch,
        compiler_params=pltpu.CompilerParams(
            dimension_semantics=("parallel",),
            vmem_limit_bytes=32 * 1024 * 1024,
        ),
    )(xr, wh, wwt)

    if Npad != N:
        y = y[:N]
    return y.reshape(B, C, out_h, out_w)


# --------------------------------------------------------------------------
# Pure-numpy reference (same weights, float64 math) for correctness checks
# --------------------------------------------------------------------------
def _reference_numpy(x, scale_factor):
    B, C, H, W = x.shape
    inv = 1.0 / float(scale_factor)
    out_h = int(np.floor(H * inv))
    out_w = int(np.floor(W * inv))
    scale = 1.0 / inv
    Wh = _resize_weight_matrix(H, out_h, scale).astype(np.float64)
    Ww = _resize_weight_matrix(W, out_w, scale).astype(np.float64)
    xn = np.asarray(x, dtype=np.float64)
    return np.einsum('ph,bchw,qw->bcpq', Wh, xn, Ww)


if __name__ == "__main__":
    key = jax.random.PRNGKey(0)
    B, C, H, W = 2, 4, 16, 16
    scale_factor = 2  # module downsamples by this factor

    x = jax.random.normal(key, (B, C, H, W), dtype=jnp.float32)

    y = jax.block_until_ready(super_resolution_operator(x, scale_factor))
    assert y.shape == (B, C, H // scale_factor, W // scale_factor), y.shape
    assert y.dtype == x.dtype

    y_ref = _reference_numpy(x, scale_factor)
    np.testing.assert_allclose(np.asarray(y), y_ref, rtol=1e-4, atol=1e-5)

    # Weights are normalized, so resizing a constant image preserves it.
    ones = jnp.ones((B, C, H, W), dtype=jnp.float32)
    y_ones = jax.block_until_ready(super_resolution_operator(ones, scale_factor))
    np.testing.assert_allclose(np.asarray(y_ones), 1.0, rtol=1e-5, atol=1e-5)

    # Wide image (W > H) exercises the height-first matmul ordering path.
    x_wide = jax.random.normal(jax.random.PRNGKey(1), (1, 2, 8, 32), dtype=jnp.float32)
    y_wide = jax.block_until_ready(super_resolution_operator(x_wide, scale_factor))
    assert y_wide.shape == (1, 2, 4, 16), y_wide.shape
    np.testing.assert_allclose(np.asarray(y_wide), _reference_numpy(x_wide, scale_factor),
                               rtol=1e-4, atol=1e-5)

    print("KERNEL_OK")
</pallas_src>

<mosaic_0001>
module attributes {stable_mosaic.version = 11 : i64} {
  func.func @kernel_width_first(%arg0: i32, %arg1: memref<4x16x16xf32, #tpu.memory_space<vmem>>, %arg2: memref<8x16xf32, #tpu.memory_space<vmem>>, %arg3: memref<16x8xf32, #tpu.memory_space<vmem>>, %arg4: memref<4x8x8xf32, #tpu.memory_space<vmem>>) attributes {dimension_semantics = [#tpu.dimension_semantics<parallel>], iteration_bounds = array<i64: 2>, scalar_prefetch = 0 : i64, scratch_operands = 0 : i64, tpu.core_type = #tpu.core_type<tc>, window_params = [{transform_indices = @transform_0, window_bounds = array<i64: 4, 16, 16>}, {pipeline_mode = #tpu.pipeline_mode<synchronous>, transform_indices = @transform_1, window_bounds = array<i64: 8, 16>}, {pipeline_mode = #tpu.pipeline_mode<synchronous>, transform_indices = @transform_2, window_bounds = array<i64: 16, 8>}, {transform_indices = @transform_3, window_bounds = array<i64: 4, 8, 8>}]} {
    %c0 = arith.constant 0 : index
    %c0_0 = arith.constant 0 : index
    %c0_1 = arith.constant 0 : index
    %0 = vector.load %arg1[%c0, %c0_0, %c0_1] : memref<4x16x16xf32, #tpu.memory_space<vmem>>, vector<4x16x16xf32>
    %1 = vector.shape_cast %0 : vector<4x16x16xf32> to vector<64x16xf32>
    %c0_2 = arith.constant 0 : index
    %c0_3 = arith.constant 0 : index
    %2 = vector.load %arg3[%c0_2, %c0_3] : memref<16x8xf32, #tpu.memory_space<vmem>>, vector<16x8xf32>
    %cst = arith.constant dense<0.000000e+00> : vector<64x8xf32>
    %3 = tpu.matmul %1, %2, %cst {dimension_numbers = #tpu.dot_dimension_numbers<[1], [0], [0], [1], [0, 0, 1, 1], [], []>} : vector<64x16xf32>, vector<16x8xf32>, vector<64x8xf32> -> vector<64x8xf32>
    %4 = vector.shape_cast %3 : vector<64x8xf32> to vector<4x16x8xf32>
    %c0_4 = arith.constant 0 : index
    %c0_5 = arith.constant 0 : index
    %5 = vector.load %arg2[%c0_4, %c0_5] : memref<8x16xf32, #tpu.memory_space<vmem>>, vector<8x16xf32>
    %6 = vector.extract_strided_slice %4 {offsets = [0, 0, 0], sizes = [1, 16, 8], strides = [1, 1, 1]} : vector<4x16x8xf32> to vector<1x16x8xf32>
    %7 = vector.shape_cast %6 : vector<1x16x8xf32> to vector<16x8xf32>
    %cst_6 = arith.constant dense<0.000000e+00> : vector<8x8xf32>
    %8 = tpu.matmul %5, %7, %cst_6 {dimension_numbers = #tpu.dot_dimension_numbers<[1], [0], [0], [1], [0, 0, 1, 1], [], []>} : vector<8x16xf32>, vector<16x8xf32>, vector<8x8xf32> -> vector<8x8xf32>
    %c0_7 = arith.constant 0 : index
    %c0_8 = arith.constant 0 : index
    %c0_9 = arith.constant 0 : index
    %9 = vector.load %arg4[%c0_7, %c0_8, %c0_9] : memref<4x8x8xf32, #tpu.memory_space<vmem>>, vector<1x8x8xf32>
    %10 = vector.shape_cast %9 : vector<1x8x8xf32> to vector<8x8xf32>
    %11 = vector.shape_cast %8 : vector<8x8xf32> to vector<1x8x8xf32>
    tpu.vector_store %arg4[%c0_7, %c0_8, %c0_9], %11 {strides = array<i32>} : memref<4x8x8xf32, #tpu.memory_space<vmem>>, vector<1x8x8xf32>,
    %12 = vector.extract_strided_slice %4 {offsets = [1, 0, 0], sizes = [1, 16, 8], strides = [1, 1, 1]} : vector<4x16x8xf32> to vector<1x16x8xf32>
    %13 = vector.shape_cast %12 : vector<1x16x8xf32> to vector<16x8xf32>
    %cst_10 = arith.constant dense<0.000000e+00> : vector<8x8xf32>
    %14 = tpu.matmul %5, %13, %cst_10 {dimension_numbers = #tpu.dot_dimension_numbers<[1], [0], [0], [1], [0, 0, 1, 1], [], []>} : vector<8x16xf32>, vector<16x8xf32>, vector<8x8xf32> -> vector<8x8xf32>
    %c1 = arith.constant 1 : index
    %c0_11 = arith.constant 0 : index
    %c0_12 = arith.constant 0 : index
    %15 = vector.load %arg4[%c1, %c0_11, %c0_12] : memref<4x8x8xf32, #tpu.memory_space<vmem>>, vector<1x8x8xf32>
    %16 = vector.shape_cast %15 : vector<1x8x8xf32> to vector<8x8xf32>
    %17 = vector.shape_cast %14 : vector<8x8xf32> to vector<1x8x8xf32>
    tpu.vector_store %arg4[%c1, %c0_11, %c0_12], %17 {strides = array<i32>} : memref<4x8x8xf32, #tpu.memory_space<vmem>>, vector<1x8x8xf32>,
    %18 = vector.extract_strided_slice %4 {offsets = [2, 0, 0], sizes = [1, 16, 8], strides = [1, 1, 1]} : vector<4x16x8xf32> to vector<1x16x8xf32>
    %19 = vector.shape_cast %18 : vector<1x16x8xf32> to vector<16x8xf32>
    %cst_13 = arith.constant dense<0.000000e+00> : vector<8x8xf32>
    %20 = tpu.matmul %5, %19, %cst_13 {dimension_numbers = #tpu.dot_dimension_numbers<[1], [0], [0], [1], [0, 0, 1, 1], [], []>} : vector<8x16xf32>, vector<16x8xf32>, vector<8x8xf32> -> vector<8x8xf32>
    %c2 = arith.constant 2 : index
    %c0_14 = arith.constant 0 : index
    %c0_15 = arith.constant 0 : index
    %21 = vector.load %arg4[%c2, %c0_14, %c0_15] : memref<4x8x8xf32, #tpu.memory_space<vmem>>, vector<1x8x8xf32>
    %22 = vector.shape_cast %21 : vector<1x8x8xf32> to vector<8x8xf32>
    %23 = vector.shape_cast %20 : vector<8x8xf32> to vector<1x8x8xf32>
    tpu.vector_store %arg4[%c2, %c0_14, %c0_15], %23 {strides = array<i32>} : memref<4x8x8xf32, #tpu.memory_space<vmem>>, vector<1x8x8xf32>,
    %24 = vector.extract_strided_slice %4 {offsets = [3, 0, 0], sizes = [1, 16, 8], strides = [1, 1, 1]} : vector<4x16x8xf32> to vector<1x16x8xf32>
    %25 = vector.shape_cast %24 : vector<1x16x8xf32> to vector<16x8xf32>
    %cst_16 = arith.constant dense<0.000000e+00> : vector<8x8xf32>
    %26 = tpu.matmul %5, %25, %cst_16 {dimension_numbers = #tpu.dot_dimension_numbers<[1], [0], [0], [1], [0, 0, 1, 1], [], []>} : vector<8x16xf32>, vector<16x8xf32>, vector<8x8xf32> -> vector<8x8xf32>
    %c3 = arith.constant 3 : index
    %c0_17 = arith.constant 0 : index
    %c0_18 = arith.constant 0 : index
    %27 = vector.load %arg4[%c3, %c0_17, %c0_18] : memref<4x8x8xf32, #tpu.memory_space<vmem>>, vector<1x8x8xf32>
    %28 = vector.shape_cast %27 : vector<1x8x8xf32> to vector<8x8xf32>
    %29 = vector.shape_cast %26 : vector<8x8xf32> to vector<1x8x8xf32>
    tpu.vector_store %arg4[%c3, %c0_17, %c0_18], %29 {strides = array<i32>} : memref<4x8x8xf32, #tpu.memory_space<vmem>>, vector<1x8x8xf32>,
    return
  }
  func.func @transform_0(%arg0: i32) -> (i32, i32, i32) {
    %c0_i32 = arith.constant 0 : i32
    %c0_i32_0 = arith.constant 0 : i32
    %c0_i32_1 = arith.constant 0 : i32
    return %arg0, %c0_i32, %c0_i32_0 : i32, i32, i32
  }
  func.func @transform_1(%arg0: i32) -> (i32, i32) {
    %c0_i32 = arith.constant 0 : i32
    %c0_i32_0 = arith.constant 0 : i32
    %c0_i32_1 = arith.constant 0 : i32
    return %c0_i32, %c0_i32_0 : i32, i32
  }
  func.func @transform_2(%arg0: i32) -> (i32, i32) {
    %c0_i32 = arith.constant 0 : i32
    %c0_i32_0 = arith.constant 0 : i32
    %c0_i32_1 = arith.constant 0 : i32
    return %c0_i32, %c0_i32_0 : i32, i32
  }
  func.func @transform_3(%arg0: i32) -> (i32, i32, i32) {
    %c0_i32 = arith.constant 0 : i32
    %c0_i32_0 = arith.constant 0 : i32
    %c0_i32_1 = arith.constant 0 : i32
    return %arg0, %c0_i32, %c0_i32_0 : i32, i32, i32
  }
}

</mosaic_0001>

<bundles_post_ra>
// kernel: tpu_custom_call.1
= control target key start
LH: loop header
LB: loop body
LE: loop exit
PB: predicated region body
PF: predicated region fallthrough
CT: control target
= control target key end

     0   :  { %8 = vsyncpa [#allocation3], 0  ;;  %s811_s0 = inlined_call_operand.hbm [shape: f32[8,16,16], index: 0, kind: input, shape index: {}]   ;;  %s812_s1 = inlined_call_operand.vmem [shape: f32[8,16], index: 1, kind: input, shape index: {}]   ;;  %s813_s2 = inlined_call_operand.vmem [shape: f32[16,8], index: 2, kind: input, shape index: {}]   ;;  %s814_s3 = inlined_call_operand.hbm [shape: f32[8,8,8], index: 3, kind: output, shape index: {}]  }
   0x1   :  { %10 = vsyncpa [#allocation3 + $0x1], 0 }
   0x2   :  { %11 = vsyncpa [#allocation4], 0 }
   0x3   :  { %13 = vsyncpa [#allocation4 + $0x1], 0  ;;  %s662_s12 = smov 0   ;;  %s664_s13 = smov 0  }
   0x4   :  { %s666_s14 = smov 0   ;;  %s668_s15 = smov 0  }
   0x5 LB: > { %s683_s16 = sadd.s32 4294967295, %s636_s15   ;;  %s451_s17 = sadd.s32 4294967294, %s636_s15   ;;  %s636_s15 = sphi %s668_s15, %s824_s15   ;;  %s632_s14 = sphi %s666_s14, %s823_s14   ;;  %s628_s13 = sphi %s664_s13, %s822_s13   ;;  %s624_s12 = sphi %s662_s12, %s821_s12  }
   0x6   : > { %s687_s18 = sadd.s32 1, %s636_s15   ;;  %s26_s19 = sadd.s32 1, %s632_s14 }
   0x7   : > { %s23_s20 = ssub.s32 %s636_s15, %s687_s18  ;;  %p33_p0 = scmp.ne.s32.totalorder %s632_s14, %s628_s13 }
   0x8   : > { %p24_p1 = scmp.eq.s32.totalorder %s23_s20, 0  ;;  %p34_p2 = scmp.eq.s32.totalorder %s636_s15, 0 }
   0x9   : > { %p39_p3 = scmp.ne.s32.totalorder %s628_s13, %s624_s12  ;;  %p40_p4 = scmp.eq.s32.totalorder %s683_s16, 0 }
   0xa   : > { %s699_s21 = scalar_select %p24_p1, %s632_s14, %s26_s19  }
   0xb   : > { %p701_p5 = por %p34_p2, %p33_p0  ;;  %p705_p6 = por %p40_p4, %p39_p3 }
   0xc   : > { %p105_p7 = scmp.eq.s32.totalorder %s683_s16, 1  ;;  %p111_p8 = scmp.eq.s32.totalorder %s451_s17, 1 }
   0xd   : > { %p502_p10 = scmp.lt.s32.totalorder %s636_s15, 2  ;;  %s137_s26 = sand.u32 1, %s632_s14  }
   0xe   : > { %p712_p11 = por %p105_p7, %p33_p0  ;;  %p716_p12 = por %p111_p8, %p39_p3 }
   0xf   : > { %s482_s27 = sshll.u32 %s636_s15, 6  ;;  %s454_s28 = sshll.u32 %s137_s26, 6 }
  0x10   : > { %s147_s4 = scalar_lea.hbm %s811_s0, %s482_s27  ;;  %s141_s6 = scalar_lea.vmem [#allocation2], %s454_s28 }
  0x11   : > { %s148_s5 = sshll.u32 %s147_s4, 4  ;;  %s150_s7 = sshll.u32 %s141_s6, 4  ;;  %s149_s5 = int_to_ptr.hbm [resolvable:$true] %s148_s5  ;;  %s151_s7 = int_to_ptr.vmem [resolvable:$true] %s150_s7 }
  0x12   : > { %p727_p13 = pnand %p502_p10, %p701_p5  ;;  %p458_p0 = scmp.ge.s32.totalorder %s636_s15, 1 }
  0x13   : > { %p158_p1 = scmp.lt.s32.totalorder %s636_s15, 3  ;;  %s138_s9 = scalar_lea.sflag [#allocation3], %s137_s26 }
  0x14   : > { %s540_s10 = sshra.s32 %s149_s5, 4  ;;  %p544_p3 = pneg %p727_p13  ;;  %s541_s10 = int_to_ptr.hbm [resolvable:$true] %s540_s10 }
  0x15   : > { %s542_s11 = scalar_lea.hbm %s541_s10, 64  ;;  %s547_s20 = scalar_lea.hbm %s811_s0, 128 }
  0x16   : > { %p543_p2 = scmp.ne.s32.totalorder %s541_s10, %s542_s11  ;;  %p548_p5 = scmp.lt.s32.totalorder %s541_s10, %s811_s0 }
  0x17   : > { %p549_p8 = scmp.lt.s32.totalorder %s547_s20, %s542_s11 }
  0x18   : > { %p545_p4 = pnand %p544_p3, %p543_p2 }
  0x19   : > { %p550_p10 = por %p549_p8, %p548_p5 }
  0x1a   : > { %p546_p7 = pneg %p545_p4 }
  0x1c   : > { %p551_p9 = pnand %p550_p10, %p546_p7 }
  0x1e   : > { %554 = shalt.err (!%p551_p9)
}
  0x1f   : > { %s638_s26 = smov 128   ;;  %s639_s28 = smov 8  }
  0x20   : > { %497 = dma.hbm_to_vmem [thread:$0]  (!%p727_p13), %s149_s5, 1024, %s151_s7, %s138_s9, %s638_s26, %s638_s26, %s639_s28  }
  0x21   : > { %p159_p2 = pnand %p458_p0, %p158_p1 }
  0x22   : > { %s748_s29 = sand.u32 (!%p159_p2), 1, %s628_s13  }
  0x23   : > { %162 = sbr.rel (%p159_p2) target bundleno = 325 (0x145), region = 32  ;;  %s459_s30 = sshll.u32 (!%p159_p2), %s748_s29, 6 }
  0x24   : > { %s165_s4 = scalar_lea.sflag (!%p159_p2), [#allocation3], %s748_s29  ;;  %s168_s6 = scalar_lea.vmem (!%p159_p2), [#allocation2], %s459_s30 }
  0x28   : > { %615 = dma.done.wait (%p705_p6), %s165_s4, 1024  }
  0x29   : > { %617 = vsyncadd (%p705_p6), %s165_s4, 4294966272  ;;  %v203_v0 = vld [vmem:[%s813_s2 + $0x8] sm:$0xff]  ;;  %v202_v1 = vld [vmem:[%s813_s2] sm:$0xff]  ;;  %vm204_vm0 = vcmask 130048   ;;  %s460_s11 = sshll.u32 %s748_s29, 5  ;;  %vm294_vm1 = vcmask 64512  }
  0x2a   : > { %243 = vmatpush.msra.mxu0 %v203_v0  ;;  %485 = vmatpush.msra.mxu2 %v203_v0  ;;  %v194_v2 = vld [vmem:[%s168_s6] sm:$0xff]  ;;  %v200_v4 = vld [vmem:[%s168_s6 + $0x30] sm:$0xff]  ;;  %v197_v5 = vld [vmem:[%s168_s6 + $0x18] sm:$0xff]  ;;  %s191_s17 = scalar_lea.vmem [#allocation5], %s460_s11  ;;  %s483_s19 = sshll.u32 %s683_s16, 5 }
  0x2b   : > { %v198_v3 = vld [vmem:[%s168_s6 + $0x20] sm:$0xff]  ;;  %486 = vmatpush.msra.mxu3 %v203_v0  ;;  %484 = vmatpush.msra.mxu1 %v203_v0  ;;  %v195_v6 = vld [vmem:[%s168_s6 + $0x8] sm:$0xff]  ;;  %v201_v8 = vld [vmem:[%s168_s6 + $0x38] sm:$0xff]  ;;  %s374_s27 = scalar_lea.hbm %s814_s3, %s483_s19  ;;  %s375_s26 = sshll.u32 %s191_s17, 4  ;;  %s376_s26 = int_to_ptr.vmem [resolvable:$true] %s375_s26 }
  0x2c   : > { %244 = vmatpush.msra.mxu0 %v202_v1  ;;  %488 = vmatpush.msra.mxu2 %v202_v1  ;;  %v199_v7 = vld [vmem:[%s168_s6 + $0x28] sm:$0xff]  ;;  %v196_v9 = vld [vmem:[%s168_s6 + $0x10] sm:$0xff]  ;;  %v270_v15 = vld [vmem:[%s812_s1] sm:$0xff]  ;;  %s377_s28 = sshll.u32 %s374_s27, 4  ;;  %s363_s30 = scalar_lea.sflag [#allocation4], %s748_s29  ;;  %s378_s28 = int_to_ptr.hbm [resolvable:$true] %s377_s28 }
  0x2d   : > { %461 = vmatmul.msk.f32.vlgmr.msra.gmra.mxu0 %vm204_vm0, %v194_v2  ;;  %465 = vmatmul.msk.f32.vlgmr.msra.gmra.mxu2 %vm204_vm0, %v198_v3  ;;  %s584_s4 = sshra.s32 %s378_s28, 4  ;;  %s590_s5 = scalar_lea.hbm %s814_s3, 64  ;;  %s585_s4 = int_to_ptr.hbm [resolvable:$true] %s584_s4 }
  0x2e   : > { %489 = vmatpush.msra.mxu3 %v202_v1  ;;  %487 = vmatpush.msra.mxu1 %v202_v1  ;;  %s586_s6 = scalar_lea.hbm %s585_s4, 32  ;;  %p591_p0 = scmp.lt.s32.totalorder %s585_s4, %s814_s3 }
  0x2f   : > { %467 = vmatmul.msk.f32.vlgmr.msra.gmra.mxu3 %vm204_vm0, %v200_v4  ;;  %464 = vmatmul.msk.f32.vlgmr.msra.gmra.mxu1 %vm204_vm0, %v197_v5  ;;  %p587_p6 = scmp.ne.s32.totalorder %s585_s4, %s586_s6  ;;  %p592_p1 = scmp.lt.s32.totalorder %s590_s5, %s586_s6 }
  0x31   : > { %p588_p9 = pnand %p587_p6, %p712_p11  ;;  %p593_p3 = por %p592_p1, %p591_p0 }
  0x33   : > { %p589_p13 = pneg %p588_p9 }
  0x35   : > { %462 = vmatmul.msk.f32.gmra.mxu0 %vm204_vm0, %v195_v6  ;;  %466 = vmatmul.msk.f32.gmra.mxu2 %vm204_vm0, %v199_v7  ;;  %p594_p4 = pnand %p593_p3, %p589_p13 }
  0x37   : > { %468 = vmatmul.msk.f32.gmra.mxu3 %vm204_vm0, %v201_v8 }
  0x3d   : > { %463 = vmatmul.msk.f32.gmra.mxu0 %vm204_vm0, %v196_v9 }
  0xaa   : > { %v246_v10 = vpop.f32.mrf.mxu0 }
  0xac   : > { %v255_v11 = vpop.f32.mrf.mxu1 }
  0xad   : > { %310 = vmatpush.msrb.mxu2 %v255_v11 }
  0xb0   : > { %v258_v12 = vpop.f32.mrf.mxu2 }
  0xb2   : > { %v249_v13 = vpop.f32.mrf.mxu0  ;;  %v264_v14 = vpop.f32.mrf.mxu3 }
  0xb3   : > { %288 = vmatpush.msrb.mxu1 %v249_v13 }
  0xb5   : > { %289 = vmatpush.msrb.mxu1 %v246_v10 }
  0xb6   : > { %469 = vmatmul.msk.f32.vlgmr.msrb.gmra.mxu1 %vm204_vm0, %v270_v15 }
  0xb8   : > { %v261_v16 = vpop.f32.mrf.mxu2 }
  0xb9   : > { %332 = vmatpush.msrb.mxu3 %v261_v16 }
  0xba   : > { %v267_v17 = vpop.f32.mrf.mxu3  ;;  %v252_v18 = vpop.f32.mrf.mxu0 }
  0xbb   : > { %333 = vmatpush.msrb.mxu3 %v258_v12  ;;  %354 = vmatpush.msra.mxu1 %v267_v17 }
  0xbc   : > { %311 = vmatpush.msrb.mxu2 %v252_v18  ;;  %472 = vmatmul.msk.f32.vlgmr.msrb.gmra.mxu3 %vm204_vm0, %v270_v15 }
  0xbd   : > { %355 = vmatpush.msra.mxu1 %v264_v14  ;;  %470 = vmatmul.msk.f32.vlgmr.msrb.gmra.mxu2 %vm204_vm0, %v270_v15 }
  0xbe   : > { %474 = vmatmul.msk.f32.vlgmr.msra.gmra.mxu1 %vm204_vm0, %v270_v15 }
 0x133   : > { %v291_v19 = vpop.f32.mrf.mxu1 }
 0x134   : > { %295 = vst.msk [vmem:[%s191_s17] sm:$0xff] %vm294_vm1, %v291_v19 }
 0x13b   : > { %v357_v20 = vpop.f32.mrf.mxu1 }
 0x13c   : > { %475 = vst.msk [vmem:[%s191_s17 + $0x18] sm:$0xff] %vm294_vm1, %v357_v20 }
 0x13f   : > { %v335_v21 = vpop.f32.mrf.mxu3 }
 0x140   : > { %v313_v22 = vpop.f32.mrf.mxu2  ;;  %473 = vst.msk [vmem:[%s191_s17 + $0x10] sm:$0xff] %vm294_vm1, %v335_v21 }
 0x141   : > { %471 = vst.msk [vmem:[%s191_s17 + $0x8] sm:$0xff] %vm294_vm1, %v313_v22 }
 0x142   : > { %597 = shalt.err (!%p594_p4)
}
 0x143   : > { %s640_s29 = smov 128   ;;  %s641_s23 = smov 8  }
 0x144   : > { %492 = dma.vmem_to_hbm [thread:$0]  (%p712_p11), %s376_s26, 512, %s378_s28, %s363_s30, %s640_s29, %s640_s29, %s641_s23  }
 0x145 PF: > { %s392_s10 = sand.u32 1, %s624_s12   ;;  %p820_p7 = scmp.ge.s32.totalorder %s636_s15, 2 }
 0x146   : > { %s393_s11 = scalar_lea.sflag [#allocation4], %s392_s10 }
 0x147   : > { %p499_p5 = pnand %p820_p7, %p716_p12 }
 0x149   : > { %p500_p8 = pneg %p499_p5 }
 0x14b   : > { %619 = dma.done.wait (%p500_p8), %s393_s11, 512  }
 0x14c   : > { %621 = vsyncadd (%p500_p8), %s393_s11, 4294966784  ;;  %p16_p10 = scmp.ge.s32.totalorder %s687_s18, 4   ;;  %s821_s12 = smov %s628_s13 }
 0x14d   : > { %s822_s13 = smov %s632_s14  ;;  %s823_s14 = smov %s699_s21 }
 0x14e   : > { %s824_s15 = smov %s687_s18  ;;  %18 = sbr.rel (!%p16_p10) target bundleno = 5 (0x5), region = 80 }
 0x153   :  { %399 = vsyncpa [#allocation3], 1 }
 0x154   :  { %401 = vsyncpa [#allocation3 + $0x1], 1 }
 0x155   :  { %402 = vsyncpa [#allocation4], 1 }
 0x156   :  { %404 = vsyncpa [#allocation4 + $0x1], 1 }

</bundles_post_ra>
